<compile_context>
chip_gen: v6e
topology: v6e:2x2x1
jax: 0.10.0
libtpu: 0.0.40
codegen_flags: <defaults>
</compile_context>

<pallas_src>
import functools

import jax
import jax.numpy as jnp
from jax.experimental import pallas as pl
from jax.experimental.pallas import tpu as pltpu

NUM_BOND_TYPE = 7
NUM_BOND_DIRECTION = 3
NUM_ATOM_TYPE = 121
NUM_CHIRALITY_TAG = 11
BN_EPS = 1e-5
SB = NUM_BOND_TYPE + NUM_BOND_DIRECTION      # 10 bond one-hot columns
SBP = 16                                     # padded to a sublane multiple


def _round_up(x, m):
    return ((x + m - 1) // m) * m


# -----------------------------------------------------------------------------
# Fused GIN forward kernel: grid axis = layer index.
#   per layer:
#     aggr = adj @ h + s_cnt @ ET_l        (gather+edge-emb+scatter collapsed)
#     h    = Linear2(ReLU(Linear1(aggr)))  (GIN MLP, bf16 MXU / f32 acc)
#     h    = BatchNorm1d(h)                (training-mode biased batch stats)
#     h    = ELU(h)                        (all layers except the last)
#   h stays resident in a VMEM scratch across layers.
# -----------------------------------------------------------------------------
def _fused_gin_kernel(x_ref, a_ref, s_ref, et_ref, w1_ref, b1_ref, w2_ref,
                      b2_ref, gamma_ref, beta_ref, out_ref, h_ref,
                      *, num_layer, last_only, mxu_bf16):
    l = pl.program_id(0)
    is_last = l == num_layer - 1
    mxu_dt = jnp.bfloat16 if mxu_bf16 else jnp.float32

    @pl.when(l == 0)
    def _():
        h_ref[...] = x_ref[...]

    h = h_ref[...]                              # [N, Dp] f32, layer-resident
    inv_n = 1.0 / h.shape[0]

    # --- GIN aggregation via precomputed graph operators (layer-invariant) ---
    #   aggr[v] = sum_{e: tgt(e)=v} (h[src(e)] + edge_emb[e])
    #           = (adj @ h)[v] + (s_cnt @ ET_l)[v]
    aggr = jnp.dot(a_ref[...], h.astype(mxu_dt),
                   preferred_element_type=jnp.float32)
    aggr = aggr + jnp.dot(s_ref[...], et_ref[...],
                          preferred_element_type=jnp.float32)

    # --- GIN MLP (bf16 MXU operands, f32 accumulate) ---
    h1 = jnp.dot(aggr.astype(mxu_dt), w1_ref[...],
                 preferred_element_type=jnp.float32) + b1_ref[...]
    h1 = jnp.maximum(h1, 0.0)
    h2 = jnp.dot(h1.astype(mxu_dt), w2_ref[...],
                 preferred_element_type=jnp.float32) + b2_ref[...]

    # --- BatchNorm1d over nodes, training-mode biased stats, one pass ---
    s1 = jnp.sum(h2, axis=0, keepdims=True)
    s2 = jnp.sum(h2 * h2, axis=0, keepdims=True)
    mean = s1 * inv_n
    var = s2 * inv_n - mean * mean
    hn = (h2 - mean) * jax.lax.rsqrt(var + BN_EPS) * gamma_ref[...] + beta_ref[...]

    # ELU on all layers except the last (F.dropout with p=0 is the identity).
    # exp goes to the EUP slot -> compute unconditionally, select by scalar,
    # so each ref is written at most once per layer.
    act = jnp.where(hn > 0.0, hn, jnp.exp(jnp.minimum(hn, 0.0)) - 1.0)
    res = jnp.where(is_last, hn, act)

    @pl.when(l != num_layer - 1)
    def _():
        h_ref[...] = res                        # carry to next layer

    if last_only:
        @pl.when(is_last)
        def _():
            out_ref[...] = res                  # single HBM writeback
    else:
        out_ref[...] = res                      # per-layer output (JK != last)


def _vmem_limit_bytes(n, dp, hp, mxu_bf16):
    f32, wb = 4, (2 if mxu_bf16 else 4)
    # double-buffered pipelined inputs
    inputs = 2 * (n * dp * f32                 # x
                  + n * n * wb                 # adj
                  + n * SBP * wb               # s_cnt
                  + SBP * dp * wb              # ET (per layer)
                  + dp * hp * wb               # w1
                  + hp * dp * wb               # w2
                  + (hp + 3 * dp) * f32)       # b1, b2, gamma, beta
    out = 2 * n * dp * f32
    scratch = n * dp * f32
    trans = (4 * n * dp + n * hp) * f32 + (2 * n * dp + n * hp) * wb
    est = inputs + out + scratch + 2 * trans + (4 << 20)
    try:
        cap = int(0.85 * pltpu.get_tpu_info().vmem_capacity_bytes)
    except Exception:
        cap = 48 << 20                          # safe on v7x (64 MiB physical)
    return int(max(8 << 20, min(cap, est)))


def fused_gin_forward(x_p, adj, s_cnt, et, w1, b1, w2, b2, gamma, beta,
                      *, num_layer, last_only, mxu_bf16=True):
    n, dp = x_p.shape
    hp = w1.shape[2]

    kernel = functools.partial(_fused_gin_kernel, num_layer=num_layer,
                               last_only=last_only, mxu_bf16=mxu_bf16)

    in_specs = [
        pl.BlockSpec((n, dp), lambda l: (0, 0)),              # x (layer-invariant)
        pl.BlockSpec((n, n), lambda l: (0, 0)),               # adjacency counts
        pl.BlockSpec((n, SBP), lambda l: (0, 0)),              # bond counts
        pl.BlockSpec((None, SBP, dp), lambda l: (l, 0, 0)),    # edge tables
        pl.BlockSpec((None, dp, hp), lambda l: (l, 0, 0)),     # w1
        pl.BlockSpec((None, 1, hp), lambda l: (l, 0, 0)),      # b1
        pl.BlockSpec((None, hp, dp), lambda l: (l, 0, 0)),     # w2
        pl.BlockSpec((None, 1, dp), lambda l: (l, 0, 0)),      # b2
        pl.BlockSpec((None, 1, dp), lambda l: (l, 0, 0)),      # gamma
        pl.BlockSpec((None, 1, dp), lambda l: (l, 0, 0)),      # beta
    ]
    if last_only:
        out_specs = pl.BlockSpec((n, dp), lambda l: (0, 0))
        out_shape = jax.ShapeDtypeStruct((n, dp), jnp.float32)
    else:
        out_specs = pl.BlockSpec((None, n, dp), lambda l: (l, 0, 0))
        out_shape = jax.ShapeDtypeStruct((num_layer, n, dp), jnp.float32)

    grid_spec = pltpu.PrefetchScalarGridSpec(
        num_scalar_prefetch=0,
        grid=(num_layer,),
        in_specs=in_specs,
        out_specs=out_specs,
        scratch_shapes=[pltpu.VMEM((n, dp), jnp.float32)],  # h resident across layers
    )

    return pl.pallas_call(
        kernel,
        out_shape=out_shape,
        grid_spec=grid_spec,
        compiler_params=pltpu.CompilerParams(
            dimension_semantics=("arbitrary",),       # layer loop carries h
            vmem_limit_bytes=_vmem_limit_bytes(n, dp, hp, mxu_bf16)),
    )(x_p, adj, s_cnt, et, w1, b1, w2, b2, gamma, beta)


# -----------------------------------------------------------------------------
# Parameter init (deterministic, in-script; mirrors the PyTorch module init)
# -----------------------------------------------------------------------------
def xavier_uniform(key, shape):
    fan_in, fan_out = shape[0], shape[1]
    a = (6.0 / (fan_in + fan_out)) ** 0.5
    return jax.random.uniform(key, shape, jnp.float32, -a, a)


def linear_init(key, fan_in, fan_out):
    kw, kb = jax.random.split(key)
    bound = 1.0 / (fan_in ** 0.5)
    w = jax.random.uniform(kw, (fan_in, fan_out), jnp.float32, -bound, bound)
    b = jax.random.uniform(kb, (1, fan_out), jnp.float32, -bound, bound)
    return w, b


def init_params(key, num_layer, emb_dim):
    keys = jax.random.split(key, 2 + num_layer)
    params = {
        "x_emb1": xavier_uniform(keys[0], (NUM_ATOM_TYPE, emb_dim)),
        "x_emb2": xavier_uniform(keys[1], (NUM_CHIRALITY_TAG, emb_dim)),
        "layers": [],
    }
    for l in range(num_layer):
        k1, k2, k3, k4 = jax.random.split(keys[2 + l], 4)
        w1, b1 = linear_init(k3, emb_dim, 2 * emb_dim)
        w2, b2 = linear_init(k4, 2 * emb_dim, emb_dim)
        params["layers"].append({
            "edge_emb1": xavier_uniform(k1, (NUM_BOND_TYPE, emb_dim)),
            "edge_emb2": xavier_uniform(k2, (NUM_BOND_DIRECTION, emb_dim)),
            "w1": w1, "b1": b1, "w2": w2, "b2": b2,
            "gamma": jnp.ones((1, emb_dim), jnp.float32),
            "beta": jnp.zeros((1, emb_dim), jnp.float32),
        })
    return params


# -----------------------------------------------------------------------------
# GNN forward: graph-operator / param packing in JAX, hot path in one fused
# Pallas kernel.
# -----------------------------------------------------------------------------
def gnn_forward(node_attr, edge_index, edge_attr, params, num_layer, emb_dim,
                jk="last", mxu_bf16=True):
    if num_layer < 2:
        raise ValueError("Number of GNN layers must be greater than 1.")
    n = node_attr.shape[0]
    dp = _round_up(emb_dim, 128)          # lane-dense feature dim
    hp = _round_up(2 * emb_dim, 128)      # lane-dense MLP hidden dim
    op_dt = jnp.bfloat16 if mxu_bf16 else jnp.float32

    # Atom embeddings (one-time, tiny); pad feature dim with zeros.
    x = params["x_emb1"][node_attr[:, 0]] + params["x_emb2"][node_attr[:, 1]]
    x_p = jnp.pad(x, ((0, 0), (0, dp - emb_dim)))

    # add_self_loops (appended) + self-loop edge_attr [4, 0]  (GINConv.forward)
    loop = jnp.arange(n, dtype=edge_index.dtype)
    ei = jnp.concatenate([edge_index, jnp.stack([loop, loop])], axis=1)
    self_loop_attr = jnp.concatenate(
        [jnp.full((n, 1), 4, edge_attr.dtype),
         jnp.zeros((n, 1), edge_attr.dtype)], axis=1)
    ea = jnp.concatenate([edge_attr, self_loop_attr], axis=0)

    src = ei[0].astype(jnp.int32)
    tgt = ei[1].astype(jnp.int32)
    ea0 = ea[:, 0].astype(jnp.int32)
    ea1 = ea[:, 1].astype(jnp.int32)

    # Layer-invariant graph operators, built once with O(E) scatter-adds:
    #   adj[v, u]   = #edges u -> v            (aggregation at target nodes)
    #   s_cnt[v, b] = #edges into v with bond type / bond direction b
    adj = jnp.zeros((n, n), jnp.float32).at[tgt, src].add(1.0).astype(op_dt)
    s_cnt = jnp.zeros((n, SBP), jnp.float32)
    s_cnt = s_cnt.at[tgt, ea0].add(1.0)
    s_cnt = s_cnt.at[tgt, NUM_BOND_TYPE + ea1].add(1.0)
    s_cnt = s_cnt.astype(op_dt)

    # Stack per-layer params on a leading layer axis, zero-padded lane-dense.
    def pad2(a, r, c):
        return jnp.pad(a, ((0, r - a.shape[0]), (0, c - a.shape[1])))

    lyr = params["layers"]
    et = jnp.stack([
        pad2(jnp.concatenate([p["edge_emb1"], p["edge_emb2"]], axis=0), SBP, dp)
        for p in lyr]).astype(op_dt)                             # [L, 16, Dp]
    w1 = jnp.stack([pad2(p["w1"], dp, hp) for p in lyr]).astype(op_dt)
    w2 = jnp.stack([pad2(p["w2"], hp, dp) for p in lyr]).astype(op_dt)
    b1 = jnp.stack([pad2(p["b1"], 1, hp) for p in lyr])
    b2 = jnp.stack([pad2(p["b2"], 1, dp) for p in lyr])
    gamma = jnp.stack([pad2(p["gamma"], 1, dp) for p in lyr])
    beta = jnp.stack([pad2(p["beta"], 1, dp) for p in lyr])

    last_only = (jk == "last")
    h_out = fused_gin_forward(x_p, adj, s_cnt, et, w1, b1, w2, b2, gamma, beta,
                              num_layer=num_layer, last_only=last_only,
                              mxu_bf16=mxu_bf16)

    if jk == "last":
        return h_out[:, :emb_dim]
    h_list = [x] + [h_out[l, :, :emb_dim] for l in range(num_layer)]
    if jk == "concat":
        return jnp.concatenate(h_list, axis=1)
    elif jk == "max":
        return jnp.max(jnp.stack(h_list, axis=0), axis=0)
    elif jk == "sum":
        return sum(h_list)
    else:
        raise ValueError(jk)


# TODO(synk): for graphs where the dense [N, N] adjacency exceeds VMEM, add an
# edge/node tiling path (inner grid over node chunks with an f32 accumulator).

if __name__ == "__main__":
    num_layer = 2
    emb_dim = 32
    N = 8          # nodes
    E = 16         # directed edges (self-loops added inside forward)

    key = jax.random.PRNGKey(0)
    kp, kn, ke, kb, kd = jax.random.split(key, 5)

    params = init_params(kp, num_layer, emb_dim)

    node_attr = jnp.stack([
        jax.random.randint(kn, (N,), 0, NUM_ATOM_TYPE),
        jax.random.randint(jax.random.fold_in(kn, 1), (N,), 0, NUM_CHIRALITY_TAG),
    ], axis=1).astype(jnp.int32)                       # [N, 2]

    edge_index = jax.random.randint(ke, (2, E), 0, N).astype(jnp.int32)  # [2, E]
    edge_attr = jnp.stack([
        jax.random.randint(kb, (E,), 0, NUM_BOND_TYPE),
        jax.random.randint(kd, (E,), 0, NUM_BOND_DIRECTION),
    ], axis=1).astype(jnp.int32)                       # [E, 2]

    out = gnn_forward(node_attr, edge_index, edge_attr, params, num_layer,
                      emb_dim, jk="last", mxu_bf16=True)
    jax.block_until_ready(out)
    assert out.shape == (N, emb_dim) and out.dtype == jnp.float32
    assert bool(jnp.all(jnp.isfinite(out)))
    print("KERNEL_OK")
</pallas_src>

<mosaic_0001>
module attributes {stable_mosaic.version = 11 : i64} {
  func.func @_fused_gin_kernel(%arg0: i32, %arg1: memref<8x128xf32, #tpu.memory_space<vmem>>, %arg2: memref<8x8xbf16, #tpu.memory_space<vmem>>, %arg3: memref<8x16xbf16, #tpu.memory_space<vmem>>, %arg4: memref<1x16x128xbf16, #tpu.memory_space<vmem>>, %arg5: memref<1x128x128xbf16, #tpu.memory_space<vmem>>, %arg6: memref<1x1x128xf32, #tpu.memory_space<vmem>>, %arg7: memref<1x128x128xbf16, #tpu.memory_space<vmem>>, %arg8: memref<1x1x128xf32, #tpu.memory_space<vmem>>, %arg9: memref<1x1x128xf32, #tpu.memory_space<vmem>>, %arg10: memref<1x1x128xf32, #tpu.memory_space<vmem>>, %arg11: memref<8x128xf32, #tpu.memory_space<vmem>>, %arg12: memref<8x128xf32, #tpu.memory_space<vmem>>) attributes {dimension_semantics = [#tpu.dimension_semantics<arbitrary>], iteration_bounds = array<i64: 2>, scalar_prefetch = 0 : i64, scratch_operands = 1 : i64, tpu.core_type = #tpu.core_type<tc>, window_params = [{pipeline_mode = #tpu.pipeline_mode<synchronous>, transform_indices = @transform_0, window_bounds = array<i64: 8, 128>}, {pipeline_mode = #tpu.pipeline_mode<synchronous>, transform_indices = @transform_1, window_bounds = array<i64: 8, 8>}, {pipeline_mode = #tpu.pipeline_mode<synchronous>, transform_indices = @transform_2, window_bounds = array<i64: 8, 16>}, {transform_indices = @transform_3, window_bounds = array<i64: 1, 16, 128>}, {transform_indices = @transform_4, window_bounds = array<i64: 1, 128, 128>}, {transform_indices = @transform_5, window_bounds = array<i64: 1, 1, 128>}, {transform_indices = @transform_6, window_bounds = array<i64: 1, 128, 128>}, {transform_indices = @transform_7, window_bounds = array<i64: 1, 1, 128>}, {transform_indices = @transform_8, window_bounds = array<i64: 1, 1, 128>}, {transform_indices = @transform_9, window_bounds = array<i64: 1, 1, 128>}, {pipeline_mode = #tpu.pipeline_mode<synchronous>, transform_indices = @transform_10, window_bounds = array<i64: 8, 128>}]} {
    %c1_i32 = arith.constant 1 : i32
    %0 = arith.cmpi eq, %arg0, %c1_i32 : i32
    %c0_i32 = arith.constant 0 : i32
    %1 = arith.cmpi eq, %arg0, %c0_i32 : i32
    %2 = arith.extui %1 : i1 to i32
    %c0_i32_0 = arith.constant 0 : i32
    %3 = arith.cmpi ne, %2, %c0_i32_0 : i32
    scf.if %3 {
      %c0_42 = arith.constant 0 : index
      %c0_43 = arith.constant 0 : index
      %71 = vector.load %arg1[%c0_42, %c0_43] : memref<8x128xf32, #tpu.memory_space<vmem>>, vector<8x128xf32>
      %c0_44 = arith.constant 0 : index
      %c0_45 = arith.constant 0 : index
      %72 = vector.load %arg12[%c0_44, %c0_45] : memref<8x128xf32, #tpu.memory_space<vmem>>, vector<8x128xf32>
      tpu.vector_store %arg12[%c0_44, %c0_45], %71 {strides = array<i32>} : memref<8x128xf32, #tpu.memory_space<vmem>>, vector<8x128xf32>,
    } else {
    }
    %c0 = arith.constant 0 : index
    %c0_1 = arith.constant 0 : index
    %4 = vector.load %arg12[%c0, %c0_1] : memref<8x128xf32, #tpu.memory_space<vmem>>, vector<8x128xf32>
    %c0_2 = arith.constant 0 : index
    %c0_3 = arith.constant 0 : index
    %5 = vector.load %arg2[%c0_2, %c0_3] : memref<8x8xbf16, #tpu.memory_space<vmem>>, vector<8x8xbf16>
    %6 = arith.truncf %4 : vector<8x128xf32> to vector<8x128xbf16>
    %cst = arith.constant dense<0.000000e+00> : vector<8x128xf32>
    %7 = tpu.matmul %5, %6, %cst {dimension_numbers = #tpu.dot_dimension_numbers<[1], [0], [0], [1], [0, 0, 1, 1], [], []>} : vector<8x8xbf16>, vector<8x128xbf16>, vector<8x128xf32> -> vector<8x128xf32>
    %c0_4 = arith.constant 0 : index
    %c0_5 = arith.constant 0 : index
    %8 = vector.load %arg3[%c0_4, %c0_5] : memref<8x16xbf16, #tpu.memory_space<vmem>>, vector<8x16xbf16>
    %c0_6 = arith.constant 0 : index
    %c0_7 = arith.constant 0 : index
    %c0_8 = arith.constant 0 : index
    %9 = vector.load %arg4[%c0_6, %c0_7, %c0_8] : memref<1x16x128xbf16, #tpu.memory_space<vmem>>, vector<1x16x128xbf16>
    %10 = vector.shape_cast %9 : vector<1x16x128xbf16> to vector<16x128xbf16>
    %cst_9 = arith.constant dense<0.000000e+00> : vector<8x128xf32>
    %11 = tpu.matmul %8, %10, %cst_9 {dimension_numbers = #tpu.dot_dimension_numbers<[1], [0], [0], [1], [0, 0, 1, 1], [], []>} : vector<8x16xbf16>, vector<16x128xbf16>, vector<8x128xf32> -> vector<8x128xf32>
    %12 = arith.addf %7, %11 : vector<8x128xf32>
    %13 = arith.truncf %12 : vector<8x128xf32> to vector<8x128xbf16>
    %c0_10 = arith.constant 0 : index
    %c0_11 = arith.constant 0 : index
    %c0_12 = arith.constant 0 : index
    %14 = vector.load %arg5[%c0_10, %c0_11, %c0_12] : memref<1x128x128xbf16, #tpu.memory_space<vmem>>, vector<1x128x128xbf16>
    %15 = vector.shape_cast %14 : vector<1x128x128xbf16> to vector<128x128xbf16>
    %cst_13 = arith.constant dense<0.000000e+00> : vector<8x128xf32>
    %16 = tpu.matmul %13, %15, %cst_13 {dimension_numbers = #tpu.dot_dimension_numbers<[1], [0], [0], [1], [0, 0, 1, 1], [], []>} : vector<8x128xbf16>, vector<128x128xbf16>, vector<8x128xf32> -> vector<8x128xf32>
    %c0_14 = arith.constant 0 : index
    %c0_15 = arith.constant 0 : index
    %c0_16 = arith.constant 0 : index
    %17 = vector.load %arg6[%c0_14, %c0_15, %c0_16] : memref<1x1x128xf32, #tpu.memory_space<vmem>>, vector<1x1x128xf32>
    %18 = vector.shape_cast %17 : vector<1x1x128xf32> to vector<1x128xf32>
    %19 = vector.broadcast %18 : vector<1x128xf32> to vector<8x128xf32>
    %20 = arith.addf %16, %19 : vector<8x128xf32>
    %cst_17 = arith.constant 0.000000e+00 : f32
    %21 = vector.broadcast %cst_17 : f32 to vector<8x128xf32>
    %22 = arith.maximumf %20, %21 : vector<8x128xf32>
    %23 = arith.truncf %22 : vector<8x128xf32> to vector<8x128xbf16>
    %c0_18 = arith.constant 0 : index
    %c0_19 = arith.constant 0 : index
    %c0_20 = arith.constant 0 : index
    %24 = vector.load %arg7[%c0_18, %c0_19, %c0_20] : memref<1x128x128xbf16, #tpu.memory_space<vmem>>, vector<1x128x128xbf16>
    %25 = vector.shape_cast %24 : vector<1x128x128xbf16> to vector<128x128xbf16>
    %cst_21 = arith.constant dense<0.000000e+00> : vector<8x128xf32>
    %26 = tpu.matmul %23, %25, %cst_21 {dimension_numbers = #tpu.dot_dimension_numbers<[1], [0], [0], [1], [0, 0, 1, 1], [], []>} : vector<8x128xbf16>, vector<128x128xbf16>, vector<8x128xf32> -> vector<8x128xf32>
    %c0_22 = arith.constant 0 : index
    %c0_23 = arith.constant 0 : index
    %c0_24 = arith.constant 0 : index
    %27 = vector.load %arg8[%c0_22, %c0_23, %c0_24] : memref<1x1x128xf32, #tpu.memory_space<vmem>>, vector<1x1x128xf32>
    %28 = vector.shape_cast %27 : vector<1x1x128xf32> to vector<1x128xf32>
    %29 = vector.broadcast %28 : vector<1x128xf32> to vector<8x128xf32>
    %30 = arith.addf %26, %29 : vector<8x128xf32>
    %cst_25 = arith.constant dense<0.000000e+00> : vector<128xf32>
    %31 = vector.multi_reduction <add>, %30, %cst_25 [0] : vector<8x128xf32> to vector<128xf32>
    %32 = vector.shape_cast %31 : vector<128xf32> to vector<1x128xf32>
    %33 = arith.mulf %30, %30 : vector<8x128xf32>
    %cst_26 = arith.constant dense<0.000000e+00> : vector<128xf32>
    %34 = vector.multi_reduction <add>, %33, %cst_26 [0] : vector<8x128xf32> to vector<128xf32>
    %35 = vector.shape_cast %34 : vector<128xf32> to vector<1x128xf32>
    %cst_27 = arith.constant 1.250000e-01 : f32
    %36 = vector.broadcast %cst_27 : f32 to vector<1x128xf32>
    %37 = arith.mulf %32, %36 : vector<1x128xf32>
    %cst_28 = arith.constant 1.250000e-01 : f32
    %38 = vector.broadcast %cst_28 : f32 to vector<1x128xf32>
    %39 = arith.mulf %35, %38 : vector<1x128xf32>
    %40 = arith.mulf %37, %37 : vector<1x128xf32>
    %41 = arith.subf %39, %40 : vector<1x128xf32>
    %42 = vector.broadcast %37 : vector<1x128xf32> to vector<8x128xf32>
    %43 = arith.subf %30, %42 : vector<8x128xf32>
    %cst_29 = arith.constant 9.99999974E-6 : f32
    %44 = vector.broadcast %cst_29 : f32 to vector<1x128xf32>
    %45 = arith.addf %41, %44 : vector<1x128xf32>
    %46 = math.rsqrt %45 : vector<1x128xf32>
    %47 = vector.broadcast %46 : vector<1x128xf32> to vector<8x128xf32>
    %48 = arith.mulf %43, %47 : vector<8x128xf32>
    %c0_30 = arith.constant 0 : index
    %c0_31 = arith.constant 0 : index
    %c0_32 = arith.constant 0 : index
    %49 = vector.load %arg9[%c0_30, %c0_31, %c0_32] : memref<1x1x128xf32, #tpu.memory_space<vmem>>, vector<1x1x128xf32>
    %50 = vector.shape_cast %49 : vector<1x1x128xf32> to vector<1x128xf32>
    %51 = vector.broadcast %50 : vector<1x128xf32> to vector<8x128xf32>
    %52 = arith.mulf %48, %51 : vector<8x128xf32>
    %c0_33 = arith.constant 0 : index
    %c0_34 = arith.constant 0 : index
    %c0_35 = arith.constant 0 : index
    %53 = vector.load %arg10[%c0_33, %c0_34, %c0_35] : memref<1x1x128xf32, #tpu.memory_space<vmem>>, vector<1x1x128xf32>
    %54 = vector.shape_cast %53 : vector<1x1x128xf32> to vector<1x128xf32>
    %55 = vector.broadcast %54 : vector<1x128xf32> to vector<8x128xf32>
    %56 = arith.addf %52, %55 : vector<8x128xf32>
    %cst_36 = arith.constant 0.000000e+00 : f32
    %57 = vector.broadcast %cst_36 : f32 to vector<8x128xf32>
    %58 = arith.cmpf ogt, %56, %57 : vector<8x128xf32>
    %cst_37 = arith.constant 0.000000e+00 : f32
    %59 = vector.broadcast %cst_37 : f32 to vector<8x128xf32>
    %60 = arith.minimumf %56, %59 : vector<8x128xf32>
    %61 = math.exp %60 : vector<8x128xf32>
    %cst_38 = arith.constant 1.000000e+00 : f32
    %62 = vector.broadcast %cst_38 : f32 to vector<8x128xf32>
    %63 = arith.subf %61, %62 : vector<8x128xf32>
    %64 = arith.select %58, %56, %63 : vector<8x128xi1>, vector<8x128xf32>
    %65 = arith.select %0, %56, %64 : vector<8x128xf32>
    %c1_i32_39 = arith.constant 1 : i32
    %66 = arith.cmpi ne, %arg0, %c1_i32_39 : i32
    %67 = arith.extui %66 : i1 to i32
    %c0_i32_40 = arith.constant 0 : i32
    %68 = arith.cmpi ne, %67, %c0_i32_40 : i32
    scf.if %68 {
      %c0_42 = arith.constant 0 : index
      %c0_43 = arith.constant 0 : index
      %71 = vector.load %arg12[%c0_42, %c0_43] : memref<8x128xf32, #tpu.memory_space<vmem>>, vector<8x128xf32>
      tpu.vector_store %arg12[%c0_42, %c0_43], %65 {strides = array<i32>} : memref<8x128xf32, #tpu.memory_space<vmem>>, vector<8x128xf32>,
    } else {
    }
    %69 = arith.extui %0 : i1 to i32
    %c0_i32_41 = arith.constant 0 : i32
    %70 = arith.cmpi ne, %69, %c0_i32_41 : i32
    scf.if %70 {
      %c0_42 = arith.constant 0 : index
      %c0_43 = arith.constant 0 : index
      %71 = vector.load %arg11[%c0_42, %c0_43] : memref<8x128xf32, #tpu.memory_space<vmem>>, vector<8x128xf32>
      tpu.vector_store %arg11[%c0_42, %c0_43], %65 {strides = array<i32>} : memref<8x128xf32, #tpu.memory_space<vmem>>, vector<8x128xf32>,
    } else {
    }
    return
  }
  func.func @transform_0(%arg0: i32) -> (i32, i32) {
    %c0_i32 = arith.constant 0 : i32
    %c0_i32_0 = arith.constant 0 : i32
    %c0_i32_1 = arith.constant 0 : i32
    return %c0_i32, %c0_i32_0 : i32, i32
  }
  func.func @transform_1(%arg0: i32) -> (i32, i32) {
    %c0_i32 = arith.constant 0 : i32
    %c0_i32_0 = arith.constant 0 : i32
    %c0_i32_1 = arith.constant 0 : i32
    return %c0_i32, %c0_i32_0 : i32, i32
  }
  func.func @transform_2(%arg0: i32) -> (i32, i32) {
    %c0_i32 = arith.constant 0 : i32
    %c0_i32_0 = arith.constant 0 : i32
    %c0_i32_1 = arith.constant 0 : i32
    return %c0_i32, %c0_i32_0 : i32, i32
  }
  func.func @transform_3(%arg0: i32) -> (i32, i32, i32) {
    %c0_i32 = arith.constant 0 : i32
    %c0_i32_0 = arith.constant 0 : i32
    %c0_i32_1 = arith.constant 0 : i32
    return %arg0, %c0_i32, %c0_i32_0 : i32, i32, i32
  }
  func.func @transform_4(%arg0: i32) -> (i32, i32, i32) {
    %c0_i32 = arith.constant 0 : i32
    %c0_i32_0 = arith.constant 0 : i32
    %c0_i32_1 = arith.constant 0 : i32
    return %arg0, %c0_i32, %c0_i32_0 : i32, i32, i32
  }
  func.func @transform_5(%arg0: i32) -> (i32, i32, i32) {
    %c0_i32 = arith.constant 0 : i32
    %c0_i32_0 = arith.constant 0 : i32
    %c0_i32_1 = arith.constant 0 : i32
    return %arg0, %c0_i32, %c0_i32_0 : i32, i32, i32
  }
  func.func @transform_6(%arg0: i32) -> (i32, i32, i32) {
    %c0_i32 = arith.constant 0 : i32
    %c0_i32_0 = arith.constant 0 : i32
    %c0_i32_1 = arith.constant 0 : i32
    return %arg0, %c0_i32, %c0_i32_0 : i32, i32, i32
  }
  func.func @transform_7(%arg0: i32) -> (i32, i32, i32) {
    %c0_i32 = arith.constant 0 : i32
    %c0_i32_0 = arith.constant 0 : i32
    %c0_i32_1 = arith.constant 0 : i32
    return %arg0, %c0_i32, %c0_i32_0 : i32, i32, i32
  }
  func.func @transform_8(%arg0: i32) -> (i32, i32, i32) {
    %c0_i32 = arith.constant 0 : i32
    %c0_i32_0 = arith.constant 0 : i32
    %c0_i32_1 = arith.constant 0 : i32
    return %arg0, %c0_i32, %c0_i32_0 : i32, i32, i32
  }
  func.func @transform_9(%arg0: i32) -> (i32, i32, i32) {
    %c0_i32 = arith.constant 0 : i32
    %c0_i32_0 = arith.constant 0 : i32
    %c0_i32_1 = arith.constant 0 : i32
    return %arg0, %c0_i32, %c0_i32_0 : i32, i32, i32
  }
  func.func @transform_10(%arg0: i32) -> (i32, i32) {
    %c0_i32 = arith.constant 0 : i32
    %c0_i32_0 = arith.constant 0 : i32
    %c0_i32_1 = arith.constant 0 : i32
    return %c0_i32, %c0_i32_0 : i32, i32
  }
}

</mosaic_0001>

<bundles_post_ra>
// kernel: tpu_custom_call.1
= control target key start
LH: loop header
LB: loop body
LE: loop exit
PB: predicated region body
PF: predicated region fallthrough
CT: control target
= control target key end

     0   :  { %s1987_s0 = inlined_call_operand.hbm [shape: f32[8,128], index: 0, kind: input, shape index: {}]   ;;  %s1988_s1 = inlined_call_operand.hbm [shape: bf16[8,8], index: 1, kind: input, shape index: {}]   ;;  %s1989_s2 = inlined_call_operand.hbm [shape: bf16[8,16], index: 2, kind: input, shape index: {}]   ;;  %s1990_s3 = inlined_call_operand.hbm [shape: bf16[2,16,128], index: 3, kind: input, shape index: {}]   ;;  %s1991_s4 = inlined_call_operand.hbm [shape: bf16[2,128,128], index: 4, kind: input, shape index: {}]   ;;  %s1992_s5 = inlined_call_operand.vmem [shape: f32[2,1,128], index: 5, kind: input, shape index: {}]   ;;  %s1993_s6 = inlined_call_operand.hbm [shape: bf16[2,128,128], index: 6, kind: input, shape index: {}]   ;;  %s1994_s7 = inlined_call_operand.vmem [shape: f32[2,1,128], index: 7, kind: input, shape index: {}]   ;;  %s1995_s8 = inlined_call_operand.vmem [shape: f32[2,1,128], index: 8, kind: input, shape index: {}]   ;;  %s1996_s9 = inlined_call_operand.vmem [shape: f32[2,1,128], index: 9, kind: input, shape index: {}]   ;;  %s1997_s10 = inlined_call_operand.hbm [shape: f32[8,128], index: 10, kind: output, shape index: {}]  }
   0x1   :  { %2017 = sst [smem:[#allocation23_spill]] %s1987_s0 }
   0x2   :  { %2018 = sst [smem:[#allocation24_spill]] %s1988_s1 }
   0x3   :  { %15 = vsyncpa [#allocation4], 0 }
   0x4   :  { %16 = vsyncpa [#allocation7], 0 }
   0x5   :  { %17 = vsyncpa [#allocation10], 0 }
   0x6   :  { %19 = vsyncpa [#allocation10 + $0x1], 0 }
   0x7   :  { %20 = vsyncpa [#allocation13], 0 }
   0x8   :  { %22 = vsyncpa [#allocation13 + $0x1], 0 }
   0x9   :  { %23 = vsyncpa [#allocation5], 0  ;;  %s1643_s13 = smov 0   ;;  %s1645_s14 = smov 0  }
   0xa   :  { %s1647_s15 = smov 0   ;;  %s1649_s16 = smov 0  }
   0xb LB: > { %2019 = sst [smem:[#allocation20_spill]] %s1571_s15  ;;  %s1662_s17 = sadd.s32 4294967295, %s1575_s16   ;;  %s1575_s16 = sphi %s1649_s16, %s2046_s16   ;;  %s1571_s15 = sphi %s1647_s15, %s2048_s15   ;;  %s1567_s14 = sphi %s1645_s14, %s2050_s14   ;;  %s1563_s13 = sphi %s1643_s13, %s2049_s13  }
   0xc   : > { %s1665_s18 = sadd.s32 1, %s1575_s16   ;;  %s99_s20 = sadd.s32 1, %s1571_s15 }
   0xd   : > { %2020 = sst [smem:[#allocation21_spill]] %s1665_s18  ;;  %s96_s19 = ssub.s32 %s1575_s16, %s1665_s18 }
   0xe   : > { %p97_p0 = scmp.eq.s32.totalorder %s96_s19, 0  ;;  %p106_p1 = scmp.ne.s32.totalorder %s1571_s15, %s1567_s14 }
   0xf   : > { %p107_p2 = scmp.eq.s32.totalorder %s1575_s16, 0  ;;  %p112_p3 = scmp.ne.s32.totalorder %s1567_s14, %s1563_s13 }
  0x10   : > { %s1675_s21 = scalar_select %p97_p0, %s1571_s15, %s99_s20  }
  0x11   : > { %p1677_p4 = por %p107_p2, %p106_p1  ;;  %p2001_p5 = scmp.eq.s32.totalorder %s1662_s17, 0 }
  0x12   : > { %2021 = sst [smem:[#allocation22_spill]] %s1675_s21  ;;  %p1098_p6 = scmp.ge.s32.totalorder %s1575_s16, 1 }
  0x13   : > { %p300_p7 = scmp.lt.s32.totalorder %s1575_s16, 3  ;;  %p1686_p8 = por %p2001_p5, %p112_p3 }
  0x14   : > { %s1577_s25 = smov [#allocation6]   ;;  %p1272_p12 = scmp.lt.s32.totalorder %s1575_s16, 2 }
  0x15   : > { %s2023_s23 = scalar_select %p1686_p8, 1, 0 }
  0x16   : > { %p1691_p10 = pnand %p1098_p6, %p300_p7  ;;  %s324_s26 = sshll.u32 %s1577_s25, 4  ;;  %s325_s26 = int_to_ptr.vmem [resolvable:$true] %s324_s26 }
  0x17   : > { %s346_s27 = sand.u32 1, %s1575_s16   ;;  %s1706_s29 = sand.u32 1, %s1571_s15  }
  0x18   : > { %s2024_s24 = scalar_select %p1691_p10, 1, 0 }
  0x19   : > { %p1249_p11 = pneg %p1691_p10  ;;  %s1150_s30 = sshll.u32 %s1575_s16, 7 }
  0x1a   : > { %s1103_s11 = sshll.u32 %s1706_s29, 3  ;;  %s1350_s12 = scalar_lea.vmem %s325_s26, 64 }
  0x1b   : > { %p1701_p13 = pnand %p1249_p11, %p2001_p5  ;;  %p1351_p1 = scmp.ne.s32.totalorder %s325_s26, %s1350_s12 }
  0x1c   : > { %p1358_p6 = scmp.lt.s32.totalorder %s325_s26, %s325_s26  ;;  %p1359_p7 = scmp.lt.s32.totalorder %s1350_s12, %s1350_s12 }
  0x1d   : > { %s2025_s28 = scalar_select %p1701_p13, 1, 0 }
  0x1e   : > { %p2002_p0 = pneg %p1701_p13  ;;  %p1360_p11 = por %p1359_p7, %p1358_p6 }
  0x20   : > { %p1353_p2 = pnand %p1351_p1, %p2002_p0 }
  0x22   : > { %p1354_p3 = pneg %p1353_p2 }
  0x24   : > { %p1361_p9 = pnand %p1360_p11, %p1354_p3 }
  0x26   : > { %1364 = shalt.err (!%p1361_p9)
}
  0x27   : > { %s2026_s1 = sld [smem:[#allocation24_spill]]  ;;  %s1723_s21 = scalar_lea.hbm %s1990_s3, %s1150_s30 }
  0x28   : > { %s350_s12 = scalar_lea.vmem [#allocation9], %s1103_s11  ;;  %p1729_p9 = pnand %p1272_p12, %p1677_p4 }
  0x29   : > { %s357_s15 = sshll.u32 %s350_s12, 4  ;;  %s1365_s13 = scalar_lea.hbm %s1723_s21, 128  ;;  %s1733_s15 = int_to_ptr.vmem [resolvable:$true] %s357_s15 }
  0x2a   : > { %s2027_s18 = scalar_select %p1729_p9, 1, 0 }
  0x2b   : > { %p1366_p1 = scmp.ne.s32.totalorder %s1723_s21, %s1365_s13  ;;  %p1741_p2 = pneg %p1729_p9 }
  0x2c   : > { %s1370_s19 = scalar_lea.hbm %s1990_s3, 256  ;;  %p1371_p4 = scmp.lt.s32.totalorder %s1723_s21, %s1990_s3 }
  0x2d   : > { %1255 = dma.hbm_to_vmem [thread:$0]  (!%p1701_p13), %s2026_s1, 64, %s325_s26, [#allocation7]  }
  0x2e   : > { %s1735_s26 = scalar_lea.sflag [#allocation10], %s346_s27  ;;  %p1368_p3 = pnand %p1741_p2, %p1366_p1 }
  0x2f   : > { %s2028_s30 = scalar_select %p1741_p2, 1, 0 }
  0x30   : > { %p1369_p6 = pneg %p1368_p3  ;;  %p1372_p12 = scmp.lt.s32.totalorder %s1370_s19, %s1365_s13 }
  0x32   : > { %p1373_p7 = por %p1372_p12, %p1371_p4 }
  0x34   : > { %p1374_p11 = pnand %p1373_p7, %p1369_p6 }
  0x36   : > { %1377 = shalt.err (!%p1374_p11)
}
  0x37   : > { %s1378_s27 = scalar_lea.vmem %s1733_s15, 128  ;;  %s1578_s12 = smov [#allocation9]  }
  0x38   : > { %p1379_p5 = scmp.ne.s32.totalorder %s1733_s15, %s1378_s27  ;;  %s1383_s22 = sshll.u32 %s1578_s12, 4  ;;  %s1384_s22 = int_to_ptr.vmem [resolvable:$false] %s1383_s22 }
  0x39   : > { %s1385_s11 = scalar_lea.vmem %s1384_s22, 256  ;;  %p1386_p0 = scmp.lt.s32.totalorder %s1733_s15, %s1384_s22 }
  0x3a   : > { %p1381_p1 = pnand %p1379_p5, %p1741_p2  ;;  %p1387_p8 = scmp.lt.s32.totalorder %s1385_s11, %s1378_s27 }
  0x3c   : > { %p1382_p3 = pneg %p1381_p1  ;;  %p1388_p10 = por %p1387_p8, %p1386_p0 }
  0x3e   : > { %p1389_p13 = pnand %p1388_p10, %p1382_p3 }
  0x40   : > { %1392 = shalt.err (!%p1389_p13)
}
  0x41   : > { %s2011_s13 = smov 64   ;;  %s2013_s19 = smov 4  }
  0x42   : > { %1262 = dma.hbm_to_vmem [thread:$0]  (!%p1729_p9), %s1723_s21, 128, %s1733_s15, %s1735_s26, %s2011_s13, %s2011_s13, %s2013_s19  }
  0x43   : > { %s1581_s20 = smov [#allocation3]   ;;  %s1582_s12 = smov [#allocation8]  }
  0x44   : > { %s313_s25 = sshll.u32 %s1581_s20, 4  ;;  %s335_s22 = sshll.u32 %s1582_s12, 4  ;;  %s314_s25 = int_to_ptr.vmem [resolvable:$true] %s313_s25  ;;  %s336_s22 = int_to_ptr.vmem [resolvable:$true] %s335_s22 }
  0x45   : > { %s1404_s27 = scalar_lea.vmem %s314_s25, 128  ;;  %p2029_p8 = scmp.ne.s32.totalorder %s2025_s28, 0 }
  0x46   : > { %p1405_p5 = scmp.ne.s32.totalorder %s314_s25, %s1404_s27  ;;  %p1412_p6 = scmp.lt.s32.totalorder %s314_s25, %s314_s25 }
  0x47   : > { %p2030_p10 = pneg %p2029_p8  ;;  %p1413_p4 = scmp.lt.s32.totalorder %s1404_s27, %s1404_s27 }
  0x49   : > { %p1407_p13 = pnand %p1405_p5, %p2030_p10  ;;  %p1414_p12 = por %p1413_p4, %p1412_p6 }
  0x4b   : > { %p1408_p0 = pneg %p1407_p13 }
  0x4d   : > { %p1415_p7 = pnand %p1414_p12, %p1408_p0 }
  0x4f   : > { %1418 = shalt.err (!%p1415_p7)
}
  0x50   : > { %s2031_s0 = sld [smem:[#allocation23_spill]]  ;;  %s1430_s11 = scalar_lea.vmem %s336_s22, 64 }
  0x51   : > { %p1431_p11 = scmp.ne.s32.totalorder %s336_s22, %s1430_s11  ;;  %p2032_p1 = pmov %p2030_p10 }
  0x52   : > { %p1438_p5 = scmp.lt.s32.totalorder %s336_s22, %s336_s22  ;;  %p1439_p10 = scmp.lt.s32.totalorder %s1430_s11, %s1430_s11 }
  0x53   : > { %p1433_p3 = pnand %p1431_p11, %p2032_p1 }
  0x54   : > { %p1440_p13 = por %p1439_p10, %p1438_p5 }
  0x55   : > { %p1434_p9 = pneg %p1433_p3 }
  0x56   : > { %1252 = dma.hbm_to_vmem [thread:$0]  (!%p2029_p8), %s2031_s0, 128, %s314_s25, [#allocation4]  }
  0x57   : > { %p1441_p2 = pnand %p1440_p13, %p1434_p9 }
  0x59   : > { %1444 = shalt.err (!%p1441_p2)
}
  0x5a   : > { %1258 = dma.hbm_to_vmem [thread:$0]  (!%p2029_p8), %s1989_s2, 64, %s336_s22, [#allocation7]  }
  0x5b   : > { %s2015_s25 = sshll.u32 %s1706_s29, 6  ;;  %s2016_s27 = sshll.u32 %s1575_s16, 10 }
  0x5c   : > { %s1790_s11 = scalar_lea.hbm %s1991_s4, %s2016_s27  ;;  %s371_s28 = scalar_lea.vmem [#allocation11], %s2015_s25 }
  0x5d   : > { %s378_s20 = sshll.u32 %s371_s28, 4  ;;  %s1445_s12 = scalar_lea.hbm %s1790_s11, 1024  ;;  %s379_s20 = int_to_ptr.vmem [resolvable:$true] %s378_s20 }
  0x5e   : > { %p1446_p9 = scmp.ne.s32.totalorder %s1790_s11, %s1445_s12  ;;  %p2033_p2 = scmp.ne.s32.totalorder %s2028_s30, 0 }
  0x5f   : > { %s1450_s19 = scalar_lea.hbm %s1991_s4, 2048  ;;  %p1451_p6 = scmp.lt.s32.totalorder %s1790_s11, %s1991_s4 }
  0x60   : > { %p1448_p0 = pnand %p1446_p9, %p2033_p2  ;;  %p1452_p4 = scmp.lt.s32.totalorder %s1450_s19, %s1445_s12 }
  0x62   : > { %p1449_p8 = pneg %p1448_p0  ;;  %p1453_p12 = por %p1452_p4, %p1451_p6 }
  0x64   : > { %p1454_p7 = pnand %p1453_p12, %p1449_p8 }
  0x66   : > { %1457 = shalt.err (!%p1454_p7)
}
  0x67   : > { %s1458_s21 = scalar_lea.vmem %s379_s20, 1024  ;;  %s1583_s28 = smov [#allocation11]  }
  0x68   : > { %p1459_p11 = scmp.ne.s32.totalorder %s379_s20, %s1458_s21  ;;  %s1463_s25 = sshll.u32 %s1583_s28, 4  ;;  %s1464_s25 = int_to_ptr.vmem [resolvable:$false] %s1463_s25 }
  0x69   : > { %s1465_s27 = scalar_lea.vmem %s1464_s25, 2048  ;;  %p1466_p5 = scmp.lt.s32.totalorder %s379_s20, %s1464_s25 }
  0x6a   : > { %p1461_p1 = pnand %p1459_p11, %p2033_p2  ;;  %p1467_p10 = scmp.lt.s32.totalorder %s1465_s27, %s1458_s21 }
  0x6c   : > { %p1462_p3 = pneg %p1461_p1  ;;  %p1468_p13 = por %p1467_p10, %p1466_p5 }
  0x6e   : > { %p1469_p9 = pnand %p1468_p13, %p1462_p3 }
  0x70   : > { %1472 = shalt.err (!%p1469_p9)
}
  0x71   : > { %p2034_p0 = scmp.ne.s32.totalorder %s2027_s18, 0  ;;  %s2035_s0 = smov 4  }
  0x72   : > { %s2036_s13 = smov 64   ;;  %s2037_s19 = sshll.u32 %s1575_s16, 10 }
  0x73   : > { %1265 = dma.hbm_to_vmem [thread:$0]  (!%p2034_p0), %s1790_s11, 1024, %s379_s20, %s1735_s26, %s2036_s13, %s2036_s13, %s2035_s0  }
  0x74   : > { %s1819_s25 = scalar_lea.hbm %s1993_s6, %s2037_s19  ;;  %s2038_s27 = sshll.u32 %s1706_s29, 6 }
  0x75   : > { %s398_s15 = scalar_lea.vmem [#allocation12], %s2038_s27  ;;  %s395_s28 = scalar_lea.sflag [#allocation13], %s1706_s29 }
  0x76   : > { %s405_s21 = sshll.u32 %s398_s15, 4  ;;  %s1473_s1 = scalar_lea.hbm %s1819_s25, 1024  ;;  %s1823_s21 = int_to_ptr.vmem [resolvable:$true] %s405_s21 }
  0x77   : > { %p1474_p8 = scmp.ne.s32.totalorder %s1819_s25, %s1473_s1  ;;  %s1478_s11 = scalar_lea.hbm %s1993_s6, 2048 }
  0x78   : > { %p1479_p12 = scmp.lt.s32.totalorder %s1819_s25, %s1993_s6  ;;  %p1480_p7 = scmp.lt.s32.totalorder %s1478_s11, %s1473_s1 }
  0x79   : > { %p1476_p6 = pnand %p1474_p8, %p2033_p2 }
  0x7a   : > { %p1481_p11 = por %p1480_p7, %p1479_p12 }
  0x7b   : > { %p1477_p4 = pneg %p1476_p6 }
  0x7d   : > { %p1482_p1 = pnand %p1481_p11, %p1477_p4 }
  0x7f   : > { %1485 = shalt.err (!%p1482_p1)
}
  0x80   : > { %s1486_s29 = scalar_lea.vmem %s1823_s21, 1024  ;;  %s1584_s12 = smov [#allocation12]  }
  0x81   : > { %p1487_p3 = scmp.ne.s32.totalorder %s1823_s21, %s1486_s29  ;;  %s1491_s22 = sshll.u32 %s1584_s12, 4  ;;  %s1492_s22 = int_to_ptr.vmem [resolvable:$false] %s1491_s22 }
  0x82   : > { %s1493_s27 = scalar_lea.vmem %s1492_s22, 2048  ;;  %p1494_p13 = scmp.lt.s32.totalorder %s1823_s21, %s1492_s22 }
  0x83   : > { %p1489_p5 = pnand %p1487_p3, %p2033_p2  ;;  %p1495_p9 = scmp.lt.s32.totalorder %s1493_s27, %s1486_s29 }
  0x85   : > { %p1490_p10 = pneg %p1489_p5  ;;  %p1496_p8 = por %p1495_p9, %p1494_p13 }
  0x87   : > { %p1497_p6 = pnand %p1496_p8, %p1490_p10 }
  0x89   : > { %1500 = shalt.err (!%p1497_p6)
}
  0x8a   : > { %1268 = dma.hbm_to_vmem [thread:$0]  (!%p2034_p0), %s1819_s25, 1024, %s1823_s21, %s395_s28, %s2036_s13, %s2036_s13, %s2035_s0  }
  0x8b   : > { %p2039_p2 = scmp.ne.s32.totalorder %s2024_s24, 0 }
  0x8c   : > { %p2040_p4 = scmp.eq.s32.totalorder (!%p2039_p2), %s1662_s17, 0 }
  0x8d   : > { %435 = sbr.rel (%p2039_p2) target bundleno = 858 (0x35a), region = 60 }
  0x92   : > { %1542 = dma.done.wait (%p2040_p4), [#allocation4], 128   ;;  %p2041_p12 = pmov %p2040_p4 }
  0x93   : > { %p2042_p7 = pmov %p2040_p4 }
  0x94   : > { %1544 = vsyncadd (%p2041_p12), [#allocation4], 4294967168 }
  0x95   : > { %1546 = dma.done.wait (%p2042_p7), [#allocation7], 128   ;;  %p2043_p11 = pmov %p2040_p4 }
  0x96   : > { %s449_s1 = sand.u32 1, %s1662_s17   ;;  %s451_s18 = sand.u32 1, %s1567_s14  }
  0x97   : > { %1548 = vsyncadd (%p2043_p11), [#allocation7], 4294967168  ;;  %s1116_s30 = sshll.u32 %s451_s18, 3  ;;  %s450_s24 = scalar_lea.sflag [#allocation10], %s449_s1 }
  0x98   : > { %s453_s0 = scalar_lea.vmem [#allocation9], %s1116_s30  ;;  %p2044_p0 = scmp.ne.s32.totalorder %s2023_s23, 0 }
  0x9a   : > { %1550 = dma.done.wait (%p2044_p0), %s450_s24, 1152  }
  0x9b   : > { %1552 = vsyncadd (%p2044_p0), %s450_s24, 4294966144  ;;  %s1117_s13 = sshll.u32 %s451_s18, 6  ;;  %s468_s15 = scalar_lea.sflag [#allocation13], %s451_s18 }
  0x9c   : > { %s1865_s25 = scalar_lea.vmem [#allocation11], %s1117_s13  ;;  %s1867_s21 = scalar_lea.vmem [#allocation12], %s1117_s13 }
  0x9d   : > { %1554 = dma.done.wait (%p2044_p0), %s468_s15, 1024  }
  0x9e   : > { %1556 = vsyncadd (%p2044_p0), %s468_s15, 4294966272  ;;  %p525_p1 = scmp.lt.s32.totalorder %s1662_s17, 1  ;;  %p538_p3 = scmp.eq.s32.totalorder %s1662_s17, 1 }
  0x9f   : > { %p2045_p5 = scmp.ne.s32.totalorder %s1662_s17, 0 }
  0xa0   : > { %s1876_s28 = scalar_select %p525_p1, %s1662_s17, 1 }
  0xa1   : > { %542 = sbr.rel (%p2045_p5) target bundleno = 168 (0xa8), region = 88 }
  0xa2   : > { %s527_s11 = scalar_lea.vmem %s1992_s5, %s1876_s28  ;;  %s530_s23 = scalar_lea.vmem %s1994_s7, %s1876_s28 }
  0xa3   : > { %s533_s22 = scalar_lea.vmem %s1995_s8, %s1876_s28  ;;  %s536_s18 = scalar_lea.vmem %s1996_s9, %s1876_s28 }
  0xa6   : > { %v543_v0 = vld [vmem:[#allocation3] sm:$0xff] }
  0xa7   : > { %544 = vst [vmem:[#allocation2] sm:$0xff] %v543_v0 }
  0xa8 PF: > { %v1318_v1 = vld [vmem:[%s453_s0] sm:$0xff]   ;;  %v1585_v2 = vmov 0.0   ;;  %vm605_vm0 = vcmask 1043456   ;;  %vm1586_vm1 = vmmov 0   ;;  %v548_v5 = vld [vmem:[#allocation8] sm:$0xf] }
  0xa9   : > { %1175 = vmatprep.subr.bf16.mxu0 %v1585_v2  ;;  %1181 = vmatprep.subr.bf16.mxu1 %v1585_v2  ;;  %vm557_vm2 = vcmask 130048   ;;  %v1319_v6 = vld [vmem:[%s1865_s25 + $0x38] sm:$0xff]   ;;  %v546_v7 = vld [vmem:[#allocation6] sm:$0xf]  ;;  %vm601_vm3 = vcmask 64512   ;;  %v1320_v9 = vld [vmem:[%s1865_s25 + $0x30] sm:$0xff]  }
  0xaa   : > { %1176 = vmatpush3.bf16.msra.mxu0 %v1318_v1  ;;  %1177 = vmatprep.mubr.msk.bf16.mxu0 %vm1586_vm1, %v1585_v2  ;;  %v1321_v10 = vld [vmem:[%s1865_s25 + $0x28] sm:$0xff]   ;;  %v1322_v11 = vld [vmem:[%s1865_s25 + $0x20] sm:$0xff]   ;;  %v1323_v12 = vld [vmem:[%s1865_s25 + $0x18] sm:$0xff]   ;;  %s917_s26 = scalar_select %p538_p3, 1, 0 }
  0xab   : > { %1183 = vmatprep.mubr.msk.bf16.mxu1 %vm1586_vm1, %v1585_v2  ;;  %1187 = vmatprep.subr.bf16.mxu0 %v1585_v2  ;;  %v1324_v13 = vld [vmem:[%s1865_s25 + $0x10] sm:$0xff]   ;;  %v1325_v14 = vld [vmem:[%s1865_s25 + $0x8] sm:$0xff]   ;;  %v1326_v15 = vld [vmem:[%s1865_s25] sm:$0xff]  }
  0xac   : > { %v1327_v16 = vld [vmem:[%s1867_s21 + $0x38] sm:$0xff]   ;;  %v1328_v17 = vld [vmem:[%s1867_s21 + $0x30] sm:$0xff]   ;;  %v1329_v18 = vld [vmem:[%s1867_s21 + $0x28] sm:$0xff]  }
  0xad   : > { %1178 = vmatmul.mubr.msk.bf16.vlgmr.msra.gmra.mxu0 %vm557_vm2, %v548_v5  ;;  %v1330_v19 = vld [vmem:[%s1867_s21 + $0x20] sm:$0xff]   ;;  %v1331_v20 = vld [vmem:[%s1867_s21 + $0x18] sm:$0xff]   ;;  %v1332_v21 = vld [vmem:[%s1867_s21 + $0x10] sm:$0xff]  }
  0xae   : > { %v545_v3 = vld [vmem:[#allocation2] sm:$0xff]  ;;  %1188 = vmatpush3.bf16.msra.mxu0 %v1319_v6  ;;  %1203 = vmatprep.mubr.msk.bf16.mxu0 %vm1586_vm1, %v1585_v2  ;;  %v1333_v32 = vld [vmem:[%s1867_s21 + $0x8] sm:$0xff]   ;;  %v1334_v33 = vld [vmem:[%s1867_s21] sm:$0xff]  }
  0xaf   : > { %v547_v4 = vpack.c.bf16 %v545_v3, %v545_v3  ;;  %1189 = vmatprep.subr.bf16.mxu0 %v1585_v2  ;;  %v1123_v34 = vld [vmem:[%s527_s11] ss:$0 sm:$0xff] }
  0xb0   : > { %v1132_v42 = vld [vmem:[%s530_s23] ss:$0 sm:$0xff] }
  0xb1   : > { %v607_v8 = vsel %vm605_vm0, %v547_v4, 0  ;;  %v1141_v4 = vld [vmem:[%s533_s22] ss:$0 sm:$0xff] }
  0xb2   : > { %1182 = vmatpush3.bf16.msra.mxu1 %v607_v8  ;;  %1190 = vmatpush3.bf16.msra.mxu0 %v1320_v9  ;;  %v1142_v6 = vld [vmem:[%s536_s18] ss:$0 sm:$0xff] }
  0xb3   : > { %1207 = vmatprep.subr.bf16.mxu1 %v1585_v2  ;;  %1191 = vmatprep.subr.bf16.mxu0 %v1585_v2 }
  0xb5   : > { %1184 = vmatmul.mubr.msk.bf16.vlgmr.msra.gmra.mxu1 %vm601_vm3, %v546_v7 }
  0xb6   : > { %1223 = vmatprep.mubr.msk.bf16.mxu1 %vm1586_vm1, %v1585_v2  ;;  %1192 = vmatpush3.bf16.msra.mxu0 %v1321_v10 }
  0xb7   : > { %1193 = vmatprep.subr.bf16.mxu0 %v1585_v2  ;;  %1208 = vmatpush3.bf16.msra.mxu1 %v1327_v16 }
  0xb8   : > { %1209 = vmatprep.subr.bf16.mxu1 %v1585_v2 }
  0xba   : > { %1194 = vmatpush3.bf16.msra.mxu0 %v1322_v11  ;;  %v918_v11 = vstv %s917_s26 }
  0xbb   : > { %1195 = vmatprep.subr.bf16.mxu0 %v1585_v2  ;;  %1210 = vmatpush3.bf16.msra.mxu1 %v1328_v17  ;;  %vm919_vm4 = vcmp.eq.s32.totalorder %v918_v11, 1 }
  0xbc   : > { %1211 = vmatprep.subr.bf16.mxu1 %v1585_v2 }
  0xbe   : > { %1196 = vmatpush3.bf16.msra.mxu0 %v1323_v12 }
  0xbf   : > { %1197 = vmatprep.subr.bf16.mxu0 %v1585_v2  ;;  %1212 = vmatpush3.bf16.msra.mxu1 %v1329_v18 }
  0xc0   : > { %1213 = vmatprep.subr.bf16.mxu1 %v1585_v2 }
  0xc2   : > { %1198 = vmatpush3.bf16.msra.mxu0 %v1324_v13 }
  0xc3   : > { %1199 = vmatprep.subr.bf16.mxu0 %v1585_v2  ;;  %1214 = vmatpush3.bf16.msra.mxu1 %v1330_v19 }
  0xc4   : > { %1215 = vmatprep.subr.bf16.mxu1 %v1585_v2 }
  0xc6   : > { %1200 = vmatpush3.bf16.msra.mxu0 %v1325_v14 }
  0xc7   : > { %1201 = vmatprep.subr.bf16.mxu0 %v1585_v2  ;;  %1216 = vmatpush3.bf16.msra.mxu1 %v1331_v20 }
  0xc8   : > { %1217 = vmatprep.subr.bf16.mxu1 %v1585_v2 }
  0xca   : > { %1202 = vmatpush3.bf16.msra.mxu0 %v1326_v15 }
  0xcb   : > { %1218 = vmatpush3.bf16.msra.mxu1 %v1332_v21 }
  0xcc   : > { %1219 = vmatprep.subr.bf16.mxu1 %v1585_v2 }
  0xcf   : > { %1220 = vmatpush3.bf16.msra.mxu1 %v1333_v32 }
  0xd0   : > { %1221 = vmatprep.subr.bf16.mxu1 %v1585_v2 }
  0xd3   : > { %1222 = vmatpush3.bf16.msra.mxu1 %v1334_v33 }
 0x16d   : > { %v595_v22 = vpop.f32.mrf.mxu0 }
 0x16f   : > { %v1179_v23 = vpop.f32.mrf.mxu0 }
 0x171   : > { %v598_v26 = vpop.f32.mrf.mxu0 }
 0x173   : > { %v1180_v29 = vpop.f32.mrf.mxu0 }
 0x175   : > { %v643_v24 = vpop.f32.mrf.mxu1 }
 0x176   : > { %v644_v25 = vadd.f32 %v643_v24, %v595_v22 }
 0x177   : > { %v1185_v27 = vpop.f32.mrf.mxu1 }
 0x178   : > { %v649_v28 = vpack.c.bf16 %v644_v25, %v644_v25 }
 0x179   : > { %v646_v30 = vpop.f32.mrf.mxu1 }
 0x17a   : > { %1204 = vmatmul.mubr.bf16.vlgmr.msra.gmra.mxu0 %v649_v28 }
 0x17b   : > { %v1186_v31 = vpop.f32.mrf.mxu1 }
 0x23a   : > { %v755_v35 = vpop.f32.mrf.mxu0 }
 0x23b   : > { %v756_v36 = vadd.f32 %v1123_v34, %v755_v35 }
 0x23c   : > { %v1205_v37 = vpop.f32.mrf.mxu0 }
 0x23d   : > { %v761_v38 = vmax.f32 %v756_v36, 0.0 }
 0x23e   : > { %v758_v39 = vpop.f32.mrf.mxu0 }
 0x23f   : > { %v762_v40 = vpack.c.bf16 %v761_v38, %v761_v38 }
 0x240   : > { %v1206_v41 = vpop.f32.mrf.mxu0 }
 0x241   : > { %1224 = vmatmul.mubr.bf16.vlgmr.msra.gmra.mxu1 %v762_v40 }
 0x301   : > { %v868_v43 = vpop.f32.mrf.mxu1 }
 0x302   : > { %v869_v44 = vadd.f32 %v1132_v42, %v868_v43 }
 0x303   : > { %v1225_v45 = vpop.f32.mrf.mxu1 }
 0x304   : > { %v874_v46 = vrot.slane %v869_v44, 4  ;;  %v880_v47 = vmul.f32 %v869_v44, %v869_v44 }
 0x305   : > { %v871_v48 = vpop.f32.mrf.mxu1 }
 0x306   : > { %v875_v49 = vadd.f32 %v874_v46, %v869_v44  ;;  %v881_v50 = vrot.slane %v880_v47, 4 }
 0x307   : > { %v1226_v51 = vpop.f32.mrf.mxu1 }
 0x308   : > { %v876_v52 = vrot.slane %v875_v49, 2  ;;  %v882_v53 = vadd.f32 %v881_v50, %v880_v47 }
 0x30a   : > { %v877_v54 = vadd.f32 %v876_v52, %v875_v49  ;;  %v883_v55 = vrot.slane %v882_v53, 2 }
 0x30c   : > { %v878_v56 = vrot.slane %v877_v54, 1  ;;  %v884_v57 = vadd.f32 %v883_v55, %v882_v53 }
 0x30e   : > { %v879_v58 = vadd.f32 %v878_v56, %v877_v54  ;;  %v885_v59 = vrot.slane %v884_v57, 1 }
 0x310   : > { %v886_v60 = vadd.f32 %v885_v59, %v884_v57  ;;  %v887_v61 = vmul.f32 0.125, %v879_v58 }
 0x312   : > { %v888_v62 = vmul.f32 0.125, %v886_v60  ;;  %v889_v63 = vmul.f32 %v887_v61, %v887_v61  ;;  %v891_v2 = vsub.f32 %v869_v44, %v887_v61 }
 0x314   : > { %v890_v0 = vsub.f32 %v888_v62, %v889_v63 }
 0x316   : > { %v892_v1 = vadd.f32 1e-05, %v890_v0 }
 0x318   : > { %1335 = vrsqrt.f32 %v892_v1 }
 0x325   : > { %v1336_v3 = vpop.eup %1335 }
 0x326   : > { %v894_v5 = vmul.f32 %v1336_v3, %v891_v2 }
 0x328   : > { %v902_v7 = vmul.f32 %v1141_v4, %v894_v5 }
 0x32a   : > { %v910_v8 = vadd.f32 %v1142_v6, %v902_v7 }
 0x32c   : > { %v912_v9 = vmin.f32 %v910_v8, 0.0  ;;  %vm911_vm5 = vcmp.gt.f32.partialorder %v910_v8, 0.0 }
 0x32e   : > { %v913_v10 = vmul.f32 1.442695, %v912_v9 }
 0x330   : > { %1337 = vpow2.f32 %v913_v10 }
 0x33d   : > { %v1338_v12 = vpop.eup %1337  ;;  %924 = sbr.rel (%p538_p3) target bundleno = 835 (0x343), region = 92 }
 0x33e   : > { %v1143_v13 = vadd.f32 -1.0, %v1338_v12 }
 0x340   : > { %v916_v14 = vsel %vm911_vm5, %v910_v8, %v1143_v13 }
 0x341   : > { %v920_v15 = vsel %vm919_vm4, %v910_v8, %v916_v14 }
 0x342   : > { %925 = vst [vmem:[#allocation2] sm:$0xff] %v920_v15 }
 0x343 PF: > { %p1145_p10 = scmp.ne.s32.totalorder %s1662_s17, 1 }
 0x345   : > { %928 = sbr.rel (%p1145_p10) target bundleno = 843 (0x34b), region = 96 }
 0x34a   : > { %929 = vst [vmem:[#allocation14] sm:$0xff] %v920_v15 }
 0x34b PF: > { %s1587_s28 = smov [#allocation14]  }
 0x34c   : > { %s937_s11 = sshll.u32 %s1587_s28, 4  ;;  %s938_s11 = int_to_ptr.vmem [resolvable:$true] %s937_s11 }
 0x34d   : > { %s1501_s20 = scalar_lea.vmem %s938_s11, 128  ;;  %p1508_p6 = scmp.lt.s32.totalorder %s938_s11, %s938_s11 }
 0x34e   : > { %p1502_p13 = scmp.ne.s32.totalorder %s938_s11, %s1501_s20  ;;  %p1509_p2 = scmp.lt.s32.totalorder %s1501_s20, %s1501_s20 }
 0x350   : > { %p1503_p9 = pnand %p1502_p13, %p538_p3  ;;  %p1510_p4 = por %p1509_p2, %p1508_p6 }
 0x352   : > { %p1504_p8 = pneg %p1503_p9 }
 0x354   : > { %p1511_p12 = pnand %p1510_p4, %p1504_p8 }
 0x356   : > { %1514 = shalt.err (!%p1511_p12)
}
 0x357   : > { %1246 = dma.vmem_to_hbm [thread:$0]  (%p538_p3), %s938_s11, 128, %s1997_s10, [#allocation5]  }
 0x358   : > { %1558 = dma.done.wait (%p538_p3), [#allocation5], 128  }
 0x359   : > { %1560 = vsyncadd (%p538_p3), [#allocation5], 4294967168 }
 0x35a PF: > { %s2046_s16 = sld [smem:[#allocation21_spill]]  ;;  %s2049_s13 = smov %s1567_s14 }
 0x35b   : > { %s2047_s29 = sld [smem:[#allocation20_spill]] }
 0x35c   : > { %s2048_s15 = sld [smem:[#allocation22_spill]] }
 0x360   : > { %p26_p7 = scmp.ge.s32.totalorder %s2046_s16, 4  }
 0x361   : > { %s2050_s14 = smov %s2047_s29 }
 0x362   :  { %28 = sbr.rel (!%p26_p7) target bundleno = 11 (0xb), region = 158 }
 0x367   :  { %950 = vsyncpa [#allocation4], 1 }
 0x368   :  { %952 = vsyncpa [#allocation4 + $0x1], 1 }
 0x369   :  { %953 = vsyncpa [#allocation7], 1 }
 0x36a   :  { %954 = vsyncpa [#allocation10], 1 }
 0x36b   :  { %956 = vsyncpa [#allocation10 + $0x1], 1 }
 0x36c   :  { %957 = vsyncpa [#allocation13], 1 }
 0x36d   :  { %959 = vsyncpa [#allocation13 + $0x1], 1 }
 0x36e   :  { %960 = vsyncpa [#allocation5], 1 }
 0x36f   :  { %962 = vsyncpa [#allocation5 + $0x1], 1 }

</bundles_post_ra>
